<compile_context>
chip_gen: v7x
topology: tpu7x:2x2x1
jax: 0.10.0
libtpu: 0.0.40
codegen_flags: <defaults>
</compile_context>

<pallas_src>
import functools

import jax
import jax.numpy as jnp
import numpy as np
from jax.experimental import pallas as pl
from jax.experimental.pallas import tpu as pltpu

_INV_LN2 = 1.4426950408889634  # 1 / ln(2)


def _jsd_kernel(preds_ref, labels_ref, out_ref, acc_ref, *,
                batch, tile_rows, tiles_per_core):
    # preds_ref : [TB, C]      float (VMEM tile)
    # labels_ref: [TB, 1]      int32 (VMEM tile)
    # out_ref   : [1, 8, 128]  f32   (per-core output block, resident across i)
    # acc_ref   : [1, C]       f32   (per-core VMEM scratch accumulator)
    c = pl.program_id(0)   # core split ("parallel")
    i = pl.program_id(1)   # batch tiles per core ("arbitrary")

    @pl.when(i == 0)
    def _init():
        acc_ref[...] = jnp.zeros_like(acc_ref)

    x = preds_ref[...].astype(jnp.float32)          # [TB, C]
    labels = labels_ref[...]                        # [TB, 1] int32
    tb, nc = x.shape

    # Softmax over the class axis, keeping the pieces needed for log2(p).
    row_max = jnp.max(x, axis=1, keepdims=True)
    shifted = x - row_max
    e = jnp.exp(shifted)
    row_sum = jnp.sum(e, axis=1, keepdims=True)     # [TB, 1]
    # Narrow reciprocal (EUP / scalar-width) so the wide op is just a multiply.
    inv_sum = pl.reciprocal(row_sum, approx=False)  # approx=True if tol allows
    p = e * inv_sum                                 # [TB, C]
    # log2(p) = (x - row_max)/ln2 - log2(row_sum); finite even if p underflows,
    # so p * log2_p is exactly 0 there (matches the reference within tolerance).
    log2_p = shifted * _INV_LN2 - jnp.log2(row_sum)

    # one-hot(labels)
    class_ids = jax.lax.broadcasted_iota(jnp.int32, (tb, nc), 1)
    onehot = (class_ids == labels).astype(jnp.float32)

    oh_plus_p = onehot + p
    # Reference clips to [1e-7, 1.0]; upper clip is a no-op since 0.5*(oh+p)<=1.
    mean_log = jnp.log2(jnp.maximum(0.5 * oh_plus_p, 1e-07))

    # kl1 + kl2, fused.
    elem = p * log2_p - oh_plus_p * mean_log        # [TB, C]

    # Mask rows past the true batch size (ragged last tile and the clamped
    # spare tile on the last core both read recycled data).
    t = c * tiles_per_core + i                      # global tile index
    row_ids = t * tile_rows + jax.lax.broadcasted_iota(jnp.int32, (tb, 1), 0)
    masked = jnp.where(row_ids < batch, elem, 0.0)

    # Single cross-sublane reduce per step into the resident vector scratch.
    acc_ref[...] += jnp.sum(masked, axis=0, keepdims=True)   # [1, C]

    @pl.when(i == tiles_per_core - 1)
    def _finalize():
        # reduce='mean': 0.5*(mean(kl1)+mean(kl2)) == 0.5/B * total_sum.
        total = jnp.sum(acc_ref[...]) * jnp.float32(0.5 / batch)
        out_ref[...] = jnp.full(out_ref.shape, total, jnp.float32)


def _choose_tile_rows(batch, num_classes, itemsize):
    # Conservative per-row VMEM cost (bytes):
    #   2x double-buffered predictions block : 2 * C * itemsize
    #   2x double-buffered labels block      : 2 * 128 * 4  ([TB,1] i32, lane-padded)
    #   ~6 live f32 [TB,C] intermediates materialized by the cross-lane reductions
    row_bytes = 2 * num_classes * itemsize + 2 * 128 * 4 + 6 * num_classes * 4
    budget = 40 * 1024 * 1024   # fits v7x's 64 MiB physical VMEM with headroom;
                                # well inside v5e/v6e's 128 MiB.
    tb = budget // row_bytes
    if tb >= batch:
        return batch            # single block covering the whole batch is legal
    gran = max(8, 32 // max(1, itemsize))   # sublane packing granularity
    # TODO(synk): for vocab-sized C (a single row blowing the budget even at
    # tb=gran) add a class-axis grid dimension with a two-pass online-softmax
    # accumulation instead of relying on a raised VMEM limit.
    return max(gran, (tb // gran) * gran)


def jsd_loss(predictions, labels, num_classes, tile_rows=None, num_cores=2):
    """JSDLoss(num_classes, reduce='mean').forward(predictions, labels)."""
    B, C = predictions.shape
    assert C == num_classes
    labels2d = labels.astype(jnp.int32).reshape(B, 1)
    itemsize = predictions.dtype.itemsize

    tb = tile_rows if tile_rows is not None else _choose_tile_rows(B, C, itemsize)
    tb = min(int(tb), B)
    if tb < B:
        gran = max(8, 32 // max(1, itemsize))
        tb = max(gran, (tb // gran) * gran)

    nt = pl.cdiv(B, tb)                          # batch tiles overall
    cores = num_cores if nt >= num_cores else 1  # v7x: use both TCs; 1 TC otherwise
    n_i = pl.cdiv(nt, cores)                     # tiles per core

    def blk_map(c, i):
        # Clamp the (at most one) spare tile on the last core to the final
        # valid block; its rows are masked to zero inside the kernel.
        return (jnp.minimum(c * n_i + i, nt - 1), 0)

    kernel = functools.partial(_jsd_kernel, batch=B, tile_rows=tb,
                               tiles_per_core=n_i)

    out = pl.pallas_call(
        kernel,
        out_shape=jax.ShapeDtypeStruct((cores, 8, 128), jnp.float32),
        grid=(cores, n_i),
        in_specs=[
            pl.BlockSpec((tb, C), blk_map),
            pl.BlockSpec((tb, 1), blk_map),
        ],
        out_specs=pl.BlockSpec((1, 8, 128), lambda c, i: (c, 0, 0)),
        scratch_shapes=[pltpu.VMEM((1, C), jnp.float32)],
        compiler_params=pltpu.CompilerParams(
            dimension_semantics=("parallel", "arbitrary"),
            vmem_limit_bytes=48 * 1024 * 1024),
        cost_estimate=pl.CostEstimate(
            flops=10 * B * C,
            transcendentals=2 * B * C,
            bytes_accessed=int(B * C * itemsize) + B * 4 + cores * 8 * 128 * 4),
    )(predictions, labels2d)

    return jnp.sum(out[:, 0, 0])


def _jsd_loss_ref(predictions, labels, num_classes):
    # Pure-JAX reference mirroring the PyTorch code, for correctness check.
    p = jax.nn.softmax(predictions.astype(jnp.float32), axis=1)
    onehot = jax.nn.one_hot(labels, num_classes, dtype=jnp.float32)
    mean_d = 0.5 * (onehot + p)
    mean_log = jnp.log2(jnp.clip(mean_d, 1e-07, 1.0))

    def kl(target):
        pos = target * (jnp.log2(jnp.maximum(target, 1e-07)) - mean_log)
        return jnp.sum(jnp.where(target > 0, pos, 0.0), axis=1)

    return 0.5 * (jnp.mean(kl(onehot)) + jnp.mean(kl(p)))


if __name__ == "__main__":
    key = jax.random.PRNGKey(0)
    k1, k2, k3, k4, k5, k6 = jax.random.split(key, 6)

    # Case 1: small shapes, single tile, single core.
    B1, C1 = 8, 32
    preds1 = jax.random.normal(k1, (B1, C1), dtype=jnp.float32)
    labels1 = jax.random.randint(k2, (B1,), 0, C1, dtype=jnp.int32)
    out1 = jax.block_until_ready(jsd_loss(preds1, labels1, C1))
    ref1 = jax.block_until_ready(_jsd_loss_ref(preds1, labels1, C1))
    assert np.allclose(np.asarray(out1), np.asarray(ref1), rtol=1e-5, atol=1e-5), (
        f"mismatch (case 1): pallas={out1} ref={ref1}")

    # Case 2: multi-tile grid, 2-way core split, ragged last tile + clamped
    # spare tile (exercises masking and the index_map clamp).
    B2, C2 = 20, 32
    preds2 = jax.random.normal(k3, (B2, C2), dtype=jnp.float32)
    labels2 = jax.random.randint(k4, (B2,), 0, C2, dtype=jnp.int32)
    out2 = jax.block_until_ready(jsd_loss(preds2, labels2, C2, tile_rows=8))
    ref2 = jax.block_until_ready(_jsd_loss_ref(preds2, labels2, C2))
    assert np.allclose(np.asarray(out2), np.asarray(ref2), rtol=1e-5, atol=1e-5), (
        f"mismatch (case 2): pallas={out2} ref={ref2}")

    # Case 3: bf16 predictions passed straight through (cast inside kernel).
    B3, C3 = 24, 48
    preds3 = jax.random.normal(k5, (B3, C3), dtype=jnp.float32).astype(jnp.bfloat16)
    labels3 = jax.random.randint(k6, (B3,), 0, C3, dtype=jnp.int32)
    out3 = jax.block_until_ready(jsd_loss(preds3, labels3, C3, tile_rows=16))
    ref3 = jax.block_until_ready(_jsd_loss_ref(preds3, labels3, C3))
    assert np.allclose(np.asarray(out3), np.asarray(ref3), rtol=1e-4, atol=1e-4), (
        f"mismatch (case 3): pallas={out3} ref={ref3}")

    print("KERNEL_OK")
</pallas_src>

<mosaic_0001>
module attributes {stable_mosaic.version = 11 : i64} {
  func.func @_jsd_kernel(%arg0: i32, %arg1: i32, %arg2: memref<8x32xf32, #tpu.memory_space<vmem>>, %arg3: memref<8x1xi32, #tpu.memory_space<vmem>>, %arg4: memref<1x8x128xf32, #tpu.memory_space<vmem>>, %arg5: memref<1x32xf32, #tpu.memory_space<vmem>>) attributes {dimension_semantics = [#tpu.dimension_semantics<parallel>, #tpu.dimension_semantics<arbitrary>], iteration_bounds = array<i64: 1, 1>, scalar_prefetch = 0 : i64, scratch_operands = 1 : i64, tpu.core_type = #tpu.core_type<tc>, window_params = [{transform_indices = @transform_0, window_bounds = array<i64: 8, 32>}, {transform_indices = @transform_1, window_bounds = array<i64: 8, 1>}, {transform_indices = @transform_2, window_bounds = array<i64: 1, 8, 128>}]} {
    %c0_i32 = arith.constant 0 : i32
    %0 = arith.cmpi eq, %arg1, %c0_i32 : i32
    %1 = arith.extui %0 : i1 to i32
    %c0_i32_0 = arith.constant 0 : i32
    %2 = arith.cmpi ne, %1, %c0_i32_0 : i32
    scf.if %2 {
      %cst_19 = arith.constant 0.000000e+00 : f32
      %60 = vector.broadcast %cst_19 : f32 to vector<1x32xf32>
      %c0_20 = arith.constant 0 : index
      %c0_21 = arith.constant 0 : index
      %61 = vector.load %arg5[%c0_20, %c0_21] : memref<1x32xf32, #tpu.memory_space<vmem>>, vector<1x32xf32>
      tpu.vector_store %arg5[%c0_20, %c0_21], %60 {strides = array<i32>} : memref<1x32xf32, #tpu.memory_space<vmem>>, vector<1x32xf32>,
    } else {
    }
    %c0 = arith.constant 0 : index
    %c0_1 = arith.constant 0 : index
    %3 = vector.load %arg2[%c0, %c0_1] : memref<8x32xf32, #tpu.memory_space<vmem>>, vector<8x32xf32>
    %c0_2 = arith.constant 0 : index
    %c0_3 = arith.constant 0 : index
    %4 = vector.load %arg3[%c0_2, %c0_3] : memref<8x1xi32, #tpu.memory_space<vmem>>, vector<8x1xi32>
    %cst = arith.constant dense<0xFF800000> : vector<8xf32>
    %5 = vector.multi_reduction <maximumf>, %3, %cst [1] : vector<8x32xf32> to vector<8xf32>
    %6 = vector.shape_cast %5 : vector<8xf32> to vector<8x1xf32>
    %7 = vector.broadcast %6 : vector<8x1xf32> to vector<8x32xf32>
    %8 = arith.subf %3, %7 : vector<8x32xf32>
    %9 = math.exp %8 : vector<8x32xf32>
    %cst_4 = arith.constant dense<0.000000e+00> : vector<8xf32>
    %10 = vector.multi_reduction <add>, %9, %cst_4 [1] : vector<8x32xf32> to vector<8xf32>
    %11 = vector.shape_cast %10 : vector<8xf32> to vector<8x1xf32>
    %12 = tpu.reciprocal %11 : vector<8x1xf32> -> vector<8x1xf32>
    %13 = vector.broadcast %12 : vector<8x1xf32> to vector<8x32xf32>
    %14 = arith.mulf %9, %13 : vector<8x32xf32>
    %cst_5 = arith.constant 1.44269502 : f32
    %15 = vector.broadcast %cst_5 : f32 to vector<8x32xf32>
    %16 = arith.mulf %8, %15 : vector<8x32xf32>
    %17 = math.log %11 : vector<8x1xf32>
    %cst_6 = arith.constant 2.000000e+00 : f32
    %18 = math.log %cst_6 : f32
    %19 = vector.broadcast %18 : f32 to vector<8x1xf32>
    %20 = arith.divf %17, %19 : vector<8x1xf32>
    %21 = vector.broadcast %20 : vector<8x1xf32> to vector<8x32xf32>
    %22 = arith.subf %16, %21 : vector<8x32xf32>
    %23 = tpu.iota {dimensions = array<i32: 1>} : vector<8x32xi32>
    %24 = vector.broadcast %4 : vector<8x1xi32> to vector<8x32xi32>
    %25 = arith.cmpi eq, %23, %24 : vector<8x32xi32>
    %26 = arith.extui %25 : vector<8x32xi1> to vector<8x32xi32>
    %27 = arith.sitofp %26 : vector<8x32xi32> to vector<8x32xf32>
    %28 = arith.addf %27, %14 : vector<8x32xf32>
    %cst_7 = arith.constant 5.000000e-01 : f32
    %29 = vector.broadcast %cst_7 : f32 to vector<8x32xf32>
    %30 = arith.mulf %29, %28 : vector<8x32xf32>
    %cst_8 = arith.constant 1.000000e-07 : f32
    %31 = vector.broadcast %cst_8 : f32 to vector<8x32xf32>
    %32 = arith.maximumf %30, %31 : vector<8x32xf32>
    %33 = math.log %32 : vector<8x32xf32>
    %cst_9 = arith.constant 2.000000e+00 : f32
    %34 = math.log %cst_9 : f32
    %35 = vector.broadcast %34 : f32 to vector<8x32xf32>
    %36 = arith.divf %33, %35 : vector<8x32xf32>
    %37 = arith.mulf %14, %22 : vector<8x32xf32>
    %38 = arith.mulf %28, %36 : vector<8x32xf32>
    %39 = arith.subf %37, %38 : vector<8x32xf32>
    %c1_i32 = arith.constant 1 : i32
    %40 = arith.muli %arg0, %c1_i32 : i32
    %41 = arith.addi %40, %arg1 : i32
    %c8_i32 = arith.constant 8 : i32
    %42 = arith.muli %41, %c8_i32 : i32
    %43 = tpu.iota {dimensions = array<i32: 0>} : vector<8x1xi32>
    %44 = vector.broadcast %42 : i32 to vector<8x1xi32>
    %45 = arith.addi %44, %43 : vector<8x1xi32>
    %c8_i32_10 = arith.constant 8 : i32
    %46 = vector.broadcast %c8_i32_10 : i32 to vector<8x1xi32>
    %47 = arith.cmpi slt, %45, %46 : vector<8x1xi32>
    %cst_11 = arith.constant 0.000000e+00 : f32
    %48 = vector.shape_cast %47 : vector<8x1xi1> to vector<8x1xi1>
    %49 = vector.broadcast %48 : vector<8x1xi1> to vector<8x32xi1>
    %50 = vector.broadcast %cst_11 : f32 to vector<8x32xf32>
    %51 = arith.select %49, %39, %50 : vector<8x32xi1>, vector<8x32xf32>
    %c0_12 = arith.constant 0 : index
    %c0_13 = arith.constant 0 : index
    %52 = vector.load %arg5[%c0_12, %c0_13] : memref<1x32xf32, #tpu.memory_space<vmem>>, vector<1x32xf32>
    %cst_14 = arith.constant dense<0.000000e+00> : vector<32xf32>
    %53 = vector.multi_reduction <add>, %51, %cst_14 [0] : vector<8x32xf32> to vector<32xf32>
    %54 = vector.shape_cast %53 : vector<32xf32> to vector<1x32xf32>
    %55 = arith.addf %52, %54 : vector<1x32xf32>
    %c0_15 = arith.constant 0 : index
    %c0_16 = arith.constant 0 : index
    %56 = vector.load %arg5[%c0_15, %c0_16] : memref<1x32xf32, #tpu.memory_space<vmem>>, vector<1x32xf32>
    tpu.vector_store %arg5[%c0_15, %c0_16], %55 {strides = array<i32>} : memref<1x32xf32, #tpu.memory_space<vmem>>, vector<1x32xf32>,
    %c0_i32_17 = arith.constant 0 : i32
    %57 = arith.cmpi eq, %arg1, %c0_i32_17 : i32
    %58 = arith.extui %57 : i1 to i32
    %c0_i32_18 = arith.constant 0 : i32
    %59 = arith.cmpi ne, %58, %c0_i32_18 : i32
    scf.if %59 {
      %c0_19 = arith.constant 0 : index
      %c0_20 = arith.constant 0 : index
      %60 = vector.load %arg5[%c0_19, %c0_20] : memref<1x32xf32, #tpu.memory_space<vmem>>, vector<1x32xf32>
      %61 = vector.shape_cast %60 : vector<1x32xf32> to vector<1x1x32xf32>
      %cst_21 = arith.constant dense<0.000000e+00> : vector<1xf32>
      %62 = vector.multi_reduction <add>, %61, %cst_21 [1, 2] : vector<1x1x32xf32> to vector<1xf32>
      %63 = vector.shape_cast %62 : vector<1xf32> to vector<1x1x1xf32>
      %64 = vector.extract %63[0, 0, 0] : f32 from vector<1x1x1xf32>
      %cst_22 = arith.constant 6.250000e-02 : f32
      %65 = arith.mulf %64, %cst_22 : f32
      %66 = vector.broadcast %65 : f32 to vector<1x8x128xf32>
      %c0_23 = arith.constant 0 : index
      %c0_24 = arith.constant 0 : index
      %c0_25 = arith.constant 0 : index
      %67 = vector.load %arg4[%c0_23, %c0_24, %c0_25] : memref<1x8x128xf32, #tpu.memory_space<vmem>>, vector<1x8x128xf32>
      tpu.vector_store %arg4[%c0_23, %c0_24, %c0_25], %66 {strides = array<i32>} : memref<1x8x128xf32, #tpu.memory_space<vmem>>, vector<1x8x128xf32>,
    } else {
    }
    return
  }
  func.func @transform_0(%arg0: i32, %arg1: i32) -> (i32, i32) {
    %c1_i32 = arith.constant 1 : i32
    %0 = arith.muli %arg0, %c1_i32 : i32
    %1 = arith.addi %0, %arg1 : i32
    %c0_i32 = arith.constant 0 : i32
    %2 = arith.minsi %1, %c0_i32 : i32
    %c0_i32_0 = arith.constant 0 : i32
    %c0_i32_1 = arith.constant 0 : i32
    return %2, %c0_i32_0 : i32, i32
  }
  func.func @transform_1(%arg0: i32, %arg1: i32) -> (i32, i32) {
    %c1_i32 = arith.constant 1 : i32
    %0 = arith.muli %arg0, %c1_i32 : i32
    %1 = arith.addi %0, %arg1 : i32
    %c0_i32 = arith.constant 0 : i32
    %2 = arith.minsi %1, %c0_i32 : i32
    %c0_i32_0 = arith.constant 0 : i32
    %c0_i32_1 = arith.constant 0 : i32
    return %2, %c0_i32_0 : i32, i32
  }
  func.func @transform_2(%arg0: i32, %arg1: i32) -> (i32, i32, i32) {
    %c0_i32 = arith.constant 0 : i32
    %c0_i32_0 = arith.constant 0 : i32
    %c0_i32_1 = arith.constant 0 : i32
    return %arg0, %c0_i32, %c0_i32_0 : i32, i32, i32
  }
}

</mosaic_0001>

<bundles_post_ra>
// kernel: tpu_custom_call.1
= control target key start
LH: loop header
LB: loop body
LE: loop exit
PB: predicated region body
PF: predicated region fallthrough
CT: control target
= control target key end

     0   :  { %vm74_vm0 = vcmask 261120   ;;  %s255_s0 = inlined_call_operand.vmem [shape: f32[8,32], index: 0, kind: input, shape index: {}]   ;;  %s256_s1 = inlined_call_operand.vmem [shape: s32[8,1], index: 1, kind: input, shape index: {}]   ;;  %s257_s2 = inlined_call_operand.hbm [shape: f32[1,8,128], index: 2, kind: output, shape index: {}]  }
   0x1   :  { %v72_v0 = vld [vmem:[%s255_s0] sm:$0xff] }
   0x2   :  { %7 = vsyncpa [#allocation4], 0  ;;  %v75_v1 = vsel %vm74_vm0, %v72_v0, -inf  ;;  %v73_v2 = vld [vmem:[%s256_s1] sm:$0xff]  ;;  %v213_v3 = vmov 0   ;;  %vm70_vm1 = vcmask 253952   ;;  %v92_v11 = vlaneseq }
   0x3   :  { %76 = vmax.xlane.f32.xlu0 %v75_v1  ;;  %179 = vset.pattern.permute.xlu1 %v213_v3  ;;  %v214_v9 = vmov 0.0   ;;  %s215_s0 = smov [#allocation3]  }
   0x4   :  { %180 = vset.pattern.permute.xlu0 %v213_v3  ;;  %95 = vperm.xlu1 %179, %v73_v2   ;;  %71 = vst.msk [vmem:[#allocation2] sm:$0x1] %vm70_vm1, %v214_v9  ;;  %v93_v12 = vand.u32 127, %v92_v11  ;;  %s153_s1 = sshll.u32 %s215_s0, 4  ;;  %s154_s1 = int_to_ptr.vmem [resolvable:$true] %s153_s1 }
   0x5   :  { %s189_s15 = scalar_lea.vmem %s154_s1, 128  ;;  %p194_p1 = scmp.lt.s32.totalorder %s154_s1, %s154_s1 }
   0x6   :  { %p190_p0 = scmp.ne.s32.totalorder %s154_s1, %s189_s15  ;;  %p195_p2 = scmp.lt.s32.totalorder %s189_s15, %s189_s15 }
   0x8   :  { %p196_p3 = por %p195_p2, %p194_p1 }
   0xa   :  { %p197_p4 = pnand %p196_p3, %p190_p0 }
   0xb   :  { %v119_v36 = vld [vmem:[#allocation2] sm:$0x1] }
  0x83   :  { %v96_v13 = vpop.permute.xlu1 %95 }
  0x84   :  { %vm97_vm2 = vcmp.eq.s32.totalorder %v93_v12, %v96_v13 }
  0x85   :  { %v173_v15 = vsel %vm97_vm2, 1.0, %v214_v9 }
  0x90   :  { %v77_v4 = vpop.xlane.xlu0 %76 }
  0x91   :  { %v78_v5 = vsub.f32 %v72_v0, %v77_v4 }
  0x93   :  { %v79_v6 = vmul.f32 1.442695, %v78_v5 }
  0x95   :  { %181 = vpow2.f32 %v79_v6 }
  0x9f   :  { %v182_v7 = vpop.eup %181 }
  0xa0   :  { %v81_v8 = vsel %vm74_vm0, %v182_v7, 0.0 }
  0xa1   :  { %82 = vadd.xlane.f32.xlu0 %v81_v8 }
 0x12e   :  { %v83_v10 = vpop.xlane.xlu0 %82 }
 0x12f   :  { %183 = vrcp.f32 %v83_v10 }
 0x130   :  { %185 = vlog2.f32 %v83_v10 }
 0x139   :  { %v184_v14 = vpop.eup %183 }
 0x13a   :  { %v85_v16 = vmul.f32 %v184_v14, %v182_v7  ;;  %v186_v20 = vpop.eup %185 }
 0x13b   :  { %v88_v21 = vmul.f32 0.6931472, %v186_v20 }
 0x13c   :  { %v100_v17 = vadd.f32 %v173_v15, %v85_v16 }
 0x13d   :  { %v90_v22 = vmul.f32 1.442695, %v88_v21 }
 0x13e   :  { %v101_v18 = vmul.f32 0.5, %v100_v17 }
 0x13f   :  { %v91_v24 = vsub.f32 %v79_v6, %v90_v22 }
 0x140   :  { %v102_v19 = vmax.f32 %v101_v18, 1e-07 }
 0x141   :  { %v106_v27 = vmul.f32 %v91_v24, %v85_v16 }
 0x142   :  { %187 = vlog2.f32 %v102_v19 }
 0x14c   :  { %v188_v23 = vpop.eup %187 }
 0x14d   :  { %v104_v25 = vmul.f32 0.6931472, %v188_v23 }
 0x14f   :  { %v105_v26 = vmul.f32 1.442695, %v104_v25 }
 0x151   :  { %v107_v28 = vmul.f32 %v105_v26, %v100_v17 }
 0x153   :  { %v108_v29 = vsub.f32 %v106_v27, %v107_v28 }
 0x155   :  { %v120_v30 = vsel %vm74_vm0, %v108_v29, 0.0 }
 0x156   :  { %v121_v31 = vrot.slane %v120_v30, 4 }
 0x158   :  { %v122_v32 = vadd.f32 %v121_v31, %v120_v30 }
 0x15a   :  { %v123_v33 = vrot.slane %v122_v32, 2 }
 0x15c   :  { %v124_v34 = vadd.f32 %v123_v33, %v122_v32 }
 0x15e   :  { %v125_v35 = vrot.slane %v124_v34, 1 }
 0x160   :  { %v126_v37 = vadd.f32 %v125_v35, %v124_v34 }
 0x162   :  { %v127_v38 = vadd.f32 %v126_v37, %v119_v36 }
 0x164   :  { %129 = vst.msk [vmem:[#allocation2] sm:$0x1] %vm70_vm1, %v127_v38 }
 0x16b   :  { %v133_v39 = vld [vmem:[#allocation2] sm:$0x1] }
 0x16c   :  { %v134_v40 = vsel %vm70_vm1, %v133_v39, 0.0 }
 0x16d   :  { %135 = vadd.xlane.f32.xlu1 %v134_v40 }
 0x1fa   :  { %v136_v41 = vpop.xlane.xlu1 %135 }
 0x1fb   :  { %v137_v42 = vrot.slane %v136_v41, 4 }
 0x1fd   :  { %v138_v43 = vadd.f32 %v137_v42, %v136_v41 }
 0x1ff   :  { %v139_v44 = vrot.slane %v138_v43, 2 }
 0x201   :  { %v140_v45 = vadd.f32 %v139_v44, %v138_v43 }
 0x203   :  { %v141_v46 = vrot.slane %v140_v45, 1 }
 0x205   :  { %v142_v47 = vadd.f32 %v141_v46, %v140_v45 }
 0x207   :  { %174 = vpush %v142_v47 }
 0x238   :  { %s175_s13 = spop %174 }
 0x239   :  { %s144_s14 = smul.f32 0.0625, %s175_s13 }
 0x23b   :  { %v145_v48 = vstv %s144_s14 }
 0x23c   :  { %146 = vst [vmem:[#allocation3] sm:$0xff] %v145_v48 }
 0x23d   :  { %200 = shalt.err (!%p197_p4)
}
 0x23e   :  { %s201_s18 = scalar_lea.hbm %s257_s2, 128 }
 0x23f   :  { %p202_p5 = scmp.ne.s32.totalorder %s257_s2, %s201_s18  ;;  %p205_p6 = scmp.lt.u32.totalorder %s201_s18, %s257_s2 }
 0x241   :  { %p207_p7 = pnand %p205_p6, %p202_p5 }
 0x243   :  { %210 = shalt.err (!%p207_p7)
}
 0x244   :  { %156 = dma.vmem_to_hbm [thread:$0]  %s154_s1, 128, %s257_s2, [#allocation4]  }
 0x245   :  { %211 = dma.done.wait [#allocation4], 128  }
 0x246   :  { %212 = vsyncadd [#allocation4], 4294967168 }
 0x247   :  { %160 = vsyncpa [#allocation4], 1 }

</bundles_post_ra>
